<compile_context>
chip_gen: v6e
topology: v6e:2x2x1
jax: 0.10.0
libtpu: 0.0.40
codegen_flags: <defaults>
</compile_context>

<pallas_src>
import functools
import math

import jax
import jax.numpy as jnp
from jax import lax
from jax.experimental import pallas as pl
from jax.experimental.pallas import tpu as pltpu


def _local_attention_kernel(x_ref, wqkv_ref, bqkv_ref, out_ref, *,
                            window_size, q_tile, k_tile):
    bt, s, h = x_ref.shape

    # ---- Fused QKV projection: one dense (bt*s, h) @ (h, 3h) MXU matmul. ----
    x2 = x_ref[...].reshape(bt * s, h)                       # bf16 (cast on host)
    qkv = jnp.dot(x2, wqkv_ref[...],
                  preferred_element_type=jnp.float32) + bqkv_ref[...]
    q = qkv[:, 0 * h:1 * h].reshape(bt, s, h).astype(jnp.bfloat16)
    k = qkv[:, 1 * h:2 * h].reshape(bt, s, h).astype(jnp.bfloat16)
    v = qkv[:, 2 * h:3 * h].reshape(bt, s, h)                # keep f32

    out_acc = jnp.zeros((bt, h), jnp.float32)

    num_q = -(-s // q_tile)
    # ---- Band-tiled online softmax over KV tiles (static Python tiling). ----
    for qi in range(num_q):
        q0 = qi * q_tile
        tq = min(q_tile, s - q0)
        q_t = q[:, q0:q0 + tq, :]

        # Key range covered by this query tile's band (static bounds).
        lo = max(0, q0 - window_size)
        hi = min(s, q0 + tq + window_size)          # exclusive
        k_lo = lo // k_tile
        k_hi = -(-hi // k_tile)

        m_i = jnp.full((bt, tq, 1), -1e30, jnp.float32)
        l_i = jnp.zeros((bt, tq, 1), jnp.float32)
        acc = jnp.zeros((bt, tq, h), jnp.float32)

        for ki in range(k_lo, k_hi):
            k0 = ki * k_tile
            tk = min(k_tile, s - k0)
            k_t = k[:, k0:k0 + tk, :]
            v_t = v[:, k0:k0 + tk, :]

            # Scaled scores (scale folded into Wq on host); contract feature dim.
            s_t = jnp.einsum('bqd,bkd->bqk', q_t, k_t,
                             preferred_element_type=jnp.float32)   # (bt,tq,tk)

            # Mask only when this tile straddles a band edge (static decision).
            fully_inside = (k0 + tk - 1 - q0 <= window_size) and \
                           (q0 + tq - 1 - k0 <= window_size)
            if not fully_inside:
                rows = q0 + lax.broadcasted_iota(jnp.int32, (tq, tk), 0)
                cols = k0 + lax.broadcasted_iota(jnp.int32, (tq, tk), 1)
                band = jnp.abs(rows - cols) <= window_size
                s_t = jnp.where(band[None], s_t, -1e30)   # finite: no NaN rows

            # Online (flash-style) softmax update.
            m_new = jnp.maximum(m_i, jnp.max(s_t, axis=-1, keepdims=True))
            alpha = jnp.exp(m_i - m_new)
            p = jnp.exp(s_t - m_new)
            l_i = alpha * l_i + jnp.sum(p, axis=-1, keepdims=True)
            acc = alpha * acc + jnp.einsum('bqk,bkh->bqh', p, v_t,
                                           preferred_element_type=jnp.float32)
            m_i = m_new

        # Normalize (EUP approx reciprocal) and reduce over query rows.
        ctx = acc * pl.reciprocal(l_i, approx=True)       # (bt, tq, h)
        out_acc = out_acc + jnp.sum(ctx, axis=1)          # (bt, h)

    # Mean over the sequence dim.
    out_ref[...] = out_acc * (1.0 / s)


def local_attention(x, wq, bq, wk, bk, wv, bv, window_size, *,
                    block_b=8, q_tile=128, k_tile=128):
    """x: (B, S, H) f32; weights are PyTorch-style (out, in); returns (B, H) f32."""
    B, S, H = x.shape
    scale = math.sqrt(H)

    # Host-side prep (free layout plumbing): fuse Q/K/V weights into one
    # (H, 3H) bf16 matrix, transpose to (in, out), fold 1/sqrt(H) into the
    # query half.  Biases stay f32 (added after f32 accumulation).
    wqkv = jnp.concatenate([wq.T / scale, wk.T, wv.T], axis=1).astype(jnp.bfloat16)
    bqkv = jnp.concatenate([bq / scale, bk, bv]).reshape(1, 3 * H).astype(jnp.float32)

    # The kernel truncates x to bf16 before every use -> DMA it as bf16.
    x = x.astype(jnp.bfloat16)

    # Pad batch to a multiple of 8 (sublane-dense tiles).  On v7x (2 TCs),
    # prefer >= 2 parallel grid steps when the batch is large enough.
    Bp = -(-B // 8) * 8
    block_b = max(8, min(block_b, Bp))
    if Bp // block_b < 2 and Bp >= 16:
        block_b = max(8, ((Bp // 2) // 8) * 8)
    nb = -(-Bp // block_b)
    Bp = nb * block_b
    if Bp != B:
        x = jnp.pad(x, ((0, Bp - B), (0, 0), (0, 0)))

    qt = max(1, min(q_tile, S))
    kt = max(1, min(k_tile, S))

    kernel = functools.partial(_local_attention_kernel,
                               window_size=window_size, q_tile=qt, k_tile=kt)

    # Advisory cost estimate (band-limited score/context work + projection).
    band = max(1, min(S, 2 * window_size + 1))
    cost = pl.CostEstimate(
        flops=2 * Bp * S * H * (3 * H) + 4 * Bp * S * band * H,
        transcendentals=Bp * S * band,
        bytes_accessed=Bp * S * H * 2 + 3 * H * H * 2 + 3 * H * 4 + Bp * H * 4,
    )

    # VMEM budget follows the actual tiled working set (not S^2); stays well
    # under v7x's 64 MiB for default tiles, grows toward v5e/v6e headroom.
    est = (2 * block_b * S * H * 2            # x double buffer (bf16)
           + 2 * (3 * H * H * 2 + 3 * H * 4)  # weights + bias (double-buffered)
           + block_b * S * 3 * H * 4          # fused qkv (f32)
           + 2 * block_b * S * H * 2          # q/k (bf16)
           + block_b * S * H * 4              # v (f32)
           + 4 * block_b * qt * kt * 4        # score / p tiles
           + 2 * block_b * qt * H * 4         # online-softmax accumulators
           + 2 * block_b * H * 4)             # output double buffer
    vmem_limit = int(min(96 * 1024 * 1024, max(32 * 1024 * 1024, 2 * est)))

    out_padded = pl.pallas_call(
        kernel,
        out_shape=jax.ShapeDtypeStruct((Bp, H), jnp.float32),
        grid_spec=pltpu.PrefetchScalarGridSpec(
            num_scalar_prefetch=0,
            grid=(nb,),
            in_specs=[
                pl.BlockSpec((block_b, S, H), lambda i: (i, 0, 0)),   # x (bf16)
                pl.BlockSpec((H, 3 * H), lambda i: (0, 0)),           # W_qkv^T
                pl.BlockSpec((1, 3 * H), lambda i: (0, 0)),           # b_qkv
            ],
            out_specs=pl.BlockSpec((block_b, H), lambda i: (i, 0)),
        ),
        compiler_params=pltpu.CompilerParams(
            dimension_semantics=("parallel",),
            vmem_limit_bytes=vmem_limit),
        cost_estimate=cost,
    )(x, wqkv, bqkv)

    return out_padded[:B]


def _reference(x, wq, bq, wk, bk, wv, bv, window_size):
    B, S, H = x.shape
    q = x @ wq.T + bq
    k = x @ wk.T + bk
    v = x @ wv.T + bv
    scores = jnp.einsum("bsh,bth->bst", q, k) / math.sqrt(H)
    i = jnp.arange(S)[:, None]
    j = jnp.arange(S)[None, :]
    mask = jnp.where(jnp.abs(i - j) <= window_size, 0.0, -jnp.inf)
    scores = scores + mask[None]
    w = jax.nn.softmax(scores, axis=-1)
    ctx = jnp.einsum("bst,bth->bsh", w, v)
    return ctx.mean(axis=1)


if __name__ == "__main__":
    B, S, H = 2, 8, 32
    window_size = 2

    key = jax.random.PRNGKey(0)
    kx, kwq, kbq, kwk, kbk, kwv, kbv = jax.random.split(key, 7)
    bound = 1.0 / math.sqrt(H)

    x = jax.random.normal(kx, (B, S, H), dtype=jnp.float32)
    wq = jax.random.uniform(kwq, (H, H), jnp.float32, -bound, bound)
    bq = jax.random.uniform(kbq, (H,), jnp.float32, -bound, bound)
    wk = jax.random.uniform(kwk, (H, H), jnp.float32, -bound, bound)
    bk = jax.random.uniform(kbk, (H,), jnp.float32, -bound, bound)
    wv = jax.random.uniform(kwv, (H, H), jnp.float32, -bound, bound)
    bv = jax.random.uniform(kbv, (H,), jnp.float32, -bound, bound)

    out = local_attention(x, wq, bq, wk, bk, wv, bv, window_size)
    out = jax.block_until_ready(out)

    ref = _reference(x, wq, bq, wk, bk, wv, bv, window_size)
    assert out.shape == (B, H)
    # bf16 x/q/k MXU operands + approx reciprocal -> loosened tolerance vs f32 ref.
    assert jnp.allclose(out, ref, atol=2e-2, rtol=2e-2), "mismatch vs reference"

    print("KERNEL_OK")
</pallas_src>

<mosaic_0001>
module attributes {stable_mosaic.version = 11 : i64} {
  func.func @_local_attention_kernel(%arg0: i32, %arg1: memref<8x8x32xbf16, #tpu.memory_space<vmem>>, %arg2: memref<32x96xbf16, #tpu.memory_space<vmem>>, %arg3: memref<1x96xf32, #tpu.memory_space<vmem>>, %arg4: memref<8x32xf32, #tpu.memory_space<vmem>>) attributes {dimension_semantics = [#tpu.dimension_semantics<parallel>], iteration_bounds = array<i64: 1>, scalar_prefetch = 0 : i64, scratch_operands = 0 : i64, tpu.core_type = #tpu.core_type<tc>, window_params = [{transform_indices = @transform_0, window_bounds = array<i64: 8, 8, 32>}, {pipeline_mode = #tpu.pipeline_mode<synchronous>, transform_indices = @transform_1, window_bounds = array<i64: 32, 96>}, {pipeline_mode = #tpu.pipeline_mode<synchronous>, transform_indices = @transform_2, window_bounds = array<i64: 1, 96>}, {transform_indices = @transform_3, window_bounds = array<i64: 8, 32>}]} {
    %c0 = arith.constant 0 : index
    %c0_0 = arith.constant 0 : index
    %c0_1 = arith.constant 0 : index
    %0 = vector.load %arg1[%c0, %c0_0, %c0_1] : memref<8x8x32xbf16, #tpu.memory_space<vmem>>, vector<8x8x32xbf16>
    %1 = vector.shape_cast %0 : vector<8x8x32xbf16> to vector<64x32xbf16>
    %c0_2 = arith.constant 0 : index
    %c0_3 = arith.constant 0 : index
    %2 = vector.load %arg2[%c0_2, %c0_3] : memref<32x96xbf16, #tpu.memory_space<vmem>>, vector<32x96xbf16>
    %cst = arith.constant dense<0.000000e+00> : vector<64x96xf32>
    %3 = tpu.matmul %1, %2, %cst {dimension_numbers = #tpu.dot_dimension_numbers<[1], [0], [0], [1], [0, 0, 1, 1], [], []>} : vector<64x32xbf16>, vector<32x96xbf16>, vector<64x96xf32> -> vector<64x96xf32>
    %c0_4 = arith.constant 0 : index
    %c0_5 = arith.constant 0 : index
    %4 = vector.load %arg3[%c0_4, %c0_5] : memref<1x96xf32, #tpu.memory_space<vmem>>, vector<1x96xf32>
    %5 = vector.broadcast %4 : vector<1x96xf32> to vector<64x96xf32>
    %6 = arith.addf %3, %5 : vector<64x96xf32>
    %7 = vector.extract_strided_slice %6 {offsets = [0, 0], sizes = [64, 32], strides = [1, 1]} : vector<64x96xf32> to vector<64x32xf32>
    %8 = vector.shape_cast %7 : vector<64x32xf32> to vector<8x8x32xf32>
    %9 = arith.truncf %8 : vector<8x8x32xf32> to vector<8x8x32xbf16>
    %10 = vector.extract_strided_slice %6 {offsets = [0, 32], sizes = [64, 32], strides = [1, 1]} : vector<64x96xf32> to vector<64x32xf32>
    %11 = vector.shape_cast %10 : vector<64x32xf32> to vector<8x8x32xf32>
    %12 = arith.truncf %11 : vector<8x8x32xf32> to vector<8x8x32xbf16>
    %13 = vector.extract_strided_slice %6 {offsets = [0, 64], sizes = [64, 32], strides = [1, 1]} : vector<64x96xf32> to vector<64x32xf32>
    %14 = vector.shape_cast %13 : vector<64x32xf32> to vector<8x8x32xf32>
    %cst_6 = arith.constant 0.000000e+00 : f32
    %15 = vector.broadcast %cst_6 : f32 to vector<8x32xf32>
    %cst_7 = arith.constant -1.000000e+30 : f32
    %16 = vector.broadcast %cst_7 : f32 to vector<8x8x1xf32>
    %cst_8 = arith.constant 0.000000e+00 : f32
    %17 = vector.broadcast %cst_8 : f32 to vector<8x8x1xf32>
    %cst_9 = arith.constant 0.000000e+00 : f32
    %18 = vector.broadcast %cst_9 : f32 to vector<8x8x32xf32>
    "tpu.trace_start"() <{level = 10 : i32, message = "bqd,bkd->bqk"}> : () -> ()
    %cst_10 = arith.constant dense<0.000000e+00> : vector<8x8x8xf32>
    %19 = tpu.matmul %9, %12, %cst_10 {dimension_numbers = #tpu.dot_dimension_numbers<[2], [2], [1], [1], [0, 0, 0, 1, 1, 1], [0], [0]>} : vector<8x8x32xbf16>, vector<8x8x32xbf16>, vector<8x8x8xf32> -> vector<8x8x8xf32>
    "tpu.trace_stop"() : () -> ()
    %20 = tpu.iota {dimensions = array<i32: 0>} : vector<8x8xi32>
    %c0_i32 = arith.constant 0 : i32
    %21 = vector.broadcast %c0_i32 : i32 to vector<8x8xi32>
    %22 = arith.addi %21, %20 : vector<8x8xi32>
    %23 = tpu.iota {dimensions = array<i32: 1>} : vector<8x8xi32>
    %c0_i32_11 = arith.constant 0 : i32
    %24 = vector.broadcast %c0_i32_11 : i32 to vector<8x8xi32>
    %25 = arith.addi %24, %23 : vector<8x8xi32>
    %26 = arith.subi %22, %25 : vector<8x8xi32>
    %27 = math.absi %26 : vector<8x8xi32>
    %c2_i32 = arith.constant 2 : i32
    %28 = vector.broadcast %c2_i32 : i32 to vector<8x8xi32>
    %29 = arith.cmpi sle, %27, %28 : vector<8x8xi32>
    %30 = vector.shape_cast %29 : vector<8x8xi1> to vector<1x8x8xi1>
    %cst_12 = arith.constant -1.000000e+30 : f32
    %31 = vector.shape_cast %30 : vector<1x8x8xi1> to vector<1x8x8xi1>
    %32 = vector.broadcast %31 : vector<1x8x8xi1> to vector<8x8x8xi1>
    %33 = vector.broadcast %cst_12 : f32 to vector<8x8x8xf32>
    %34 = arith.select %32, %19, %33 : vector<8x8x8xi1>, vector<8x8x8xf32>
    %cst_13 = arith.constant dense<0xFF800000> : vector<8x8xf32>
    %35 = vector.multi_reduction <maximumf>, %34, %cst_13 [2] : vector<8x8x8xf32> to vector<8x8xf32>
    %36 = vector.shape_cast %35 : vector<8x8xf32> to vector<8x8x1xf32>
    %37 = arith.maximumf %16, %36 : vector<8x8x1xf32>
    %38 = arith.subf %16, %37 : vector<8x8x1xf32>
    %39 = math.exp %38 : vector<8x8x1xf32>
    %40 = vector.broadcast %37 : vector<8x8x1xf32> to vector<8x8x8xf32>
    %41 = arith.subf %34, %40 : vector<8x8x8xf32>
    %42 = math.exp %41 : vector<8x8x8xf32>
    %43 = arith.mulf %39, %17 : vector<8x8x1xf32>
    %cst_14 = arith.constant dense<0.000000e+00> : vector<8x8xf32>
    %44 = vector.multi_reduction <add>, %42, %cst_14 [2] : vector<8x8x8xf32> to vector<8x8xf32>
    %45 = vector.shape_cast %44 : vector<8x8xf32> to vector<8x8x1xf32>
    %46 = arith.addf %43, %45 : vector<8x8x1xf32>
    %47 = vector.broadcast %39 : vector<8x8x1xf32> to vector<8x8x32xf32>
    %48 = arith.mulf %47, %18 : vector<8x8x32xf32>
    "tpu.trace_start"() <{level = 10 : i32, message = "bqk,bkh->bqh"}> : () -> ()
    %cst_15 = arith.constant dense<0.000000e+00> : vector<8x8x32xf32>
    %49 = tpu.matmul %42, %14, %cst_15 {dimension_numbers = #tpu.dot_dimension_numbers<[2], [1], [1], [2], [0, 0, 0, 1, 1, 2], [0], [0]>} : vector<8x8x8xf32>, vector<8x8x32xf32>, vector<8x8x32xf32> -> vector<8x8x32xf32>
    "tpu.trace_stop"() : () -> ()
    %50 = arith.addf %48, %49 : vector<8x8x32xf32>
    %51 = tpu.reciprocal %46 {approx = true} : vector<8x8x1xf32> -> vector<8x8x1xf32>
    %52 = vector.broadcast %51 : vector<8x8x1xf32> to vector<8x8x32xf32>
    %53 = arith.mulf %50, %52 : vector<8x8x32xf32>
    %cst_16 = arith.constant dense<0.000000e+00> : vector<8x32xf32>
    %54 = vector.multi_reduction <add>, %53, %cst_16 [1] : vector<8x8x32xf32> to vector<8x32xf32>
    %55 = arith.addf %15, %54 : vector<8x32xf32>
    %cst_17 = arith.constant 1.250000e-01 : f32
    %56 = vector.broadcast %cst_17 : f32 to vector<8x32xf32>
    %57 = arith.mulf %55, %56 : vector<8x32xf32>
    %c0_18 = arith.constant 0 : index
    %c0_19 = arith.constant 0 : index
    %58 = vector.load %arg4[%c0_18, %c0_19] : memref<8x32xf32, #tpu.memory_space<vmem>>, vector<8x32xf32>
    tpu.vector_store %arg4[%c0_18, %c0_19], %57 {strides = array<i32>} : memref<8x32xf32, #tpu.memory_space<vmem>>, vector<8x32xf32>,
    return
  }
  func.func @transform_0(%arg0: i32) -> (i32, i32, i32) {
    %c0_i32 = arith.constant 0 : i32
    %c0_i32_0 = arith.constant 0 : i32
    %c0_i32_1 = arith.constant 0 : i32
    return %arg0, %c0_i32, %c0_i32_0 : i32, i32, i32
  }
  func.func @transform_1(%arg0: i32) -> (i32, i32) {
    %c0_i32 = arith.constant 0 : i32
    %c0_i32_0 = arith.constant 0 : i32
    %c0_i32_1 = arith.constant 0 : i32
    return %c0_i32, %c0_i32_0 : i32, i32
  }
  func.func @transform_2(%arg0: i32) -> (i32, i32) {
    %c0_i32 = arith.constant 0 : i32
    %c0_i32_0 = arith.constant 0 : i32
    %c0_i32_1 = arith.constant 0 : i32
    return %c0_i32, %c0_i32_0 : i32, i32
  }
  func.func @transform_3(%arg0: i32) -> (i32, i32) {
    %c0_i32 = arith.constant 0 : i32
    %c0_i32_0 = arith.constant 0 : i32
    return %arg0, %c0_i32 : i32, i32
  }
}

</mosaic_0001>

<bundles_post_ra>
// kernel: tpu_custom_call.1
= control target key start
LH: loop header
LB: loop body
LE: loop exit
PB: predicated region body
PF: predicated region fallthrough
CT: control target
= control target key end

     0   :  { %8 = vsyncpa [#allocation3], 0  ;;  %s2001_s0 = inlined_call_operand.hbm [shape: bf16[8,8,32], index: 0, kind: input, shape index: {}]   ;;  %s2002_s1 = inlined_call_operand.hbm [shape: bf16[32,96], index: 1, kind: input, shape index: {}]   ;;  %s2003_s2 = inlined_call_operand.vmem [shape: f32[1,96], index: 2, kind: input, shape index: {}]   ;;  %s2004_s3 = inlined_call_operand.hbm [shape: f32[8,32], index: 3, kind: output, shape index: {}]  }
   0x1   :  { %9 = vsyncpa [#allocation6], 0 }
   0x2   :  { %10 = vsyncpa [#allocation4], 0  ;;  %s1759_s12 = smov [#allocation2]  }
   0x3   :  { %s16_s13 = sshll.u32 %s1759_s12, 4  ;;  %s17_s13 = int_to_ptr.vmem [resolvable:$true] %s16_s13 }
   0x4   :  { %s1701_s14 = scalar_lea.vmem %s17_s13, 512  ;;  %p1706_p1 = scmp.lt.s32.totalorder %s17_s13, %s17_s13 }
   0x5   :  { %p1702_p0 = scmp.ne.s32.totalorder %s17_s13, %s1701_s14  ;;  %p1707_p2 = scmp.lt.s32.totalorder %s1701_s14, %s1701_s14 }
   0x7   :  { %p1708_p3 = por %p1707_p2, %p1706_p1 }
   0x9   :  { %p1709_p4 = pnand %p1708_p3, %p1702_p0 }
   0xb   :  { %1712 = shalt.err (!%p1709_p4)
}
   0xc   :  { %s1760_s15 = smov 64   ;;  %s1761_s16 = smov 4  }
   0xd   :  { %22 = dma.hbm_to_vmem [thread:$0]  %s2001_s0, 512, %s17_s13, [#allocation3], %s1760_s15, %s1760_s15, %s1761_s16  }
   0xe   :  { %s1762_s19 = smov [#allocation5]  }
   0xf   :  { %s28_s20 = sshll.u32 %s1762_s19, 4  ;;  %s29_s20 = int_to_ptr.vmem [resolvable:$true] %s28_s20 }
  0x10   :  { %s1721_s21 = scalar_lea.vmem %s29_s20, 256  ;;  %p1726_p6 = scmp.lt.s32.totalorder %s29_s20, %s29_s20 }
  0x11   :  { %p1722_p5 = scmp.ne.s32.totalorder %s29_s20, %s1721_s21  ;;  %p1727_p7 = scmp.lt.s32.totalorder %s1721_s21, %s1721_s21 }
  0x13   :  { %p1728_p8 = por %p1727_p7, %p1726_p6 }
  0x15   :  { %p1729_p9 = pnand %p1728_p8, %p1722_p5 }
  0x17   :  { %1732 = shalt.err (!%p1729_p9)
}
  0x18   :  { %34 = dma.hbm_to_vmem [thread:$0]  %s2002_s1, 256, %s29_s20, [#allocation6], %s1760_s15, %s1760_s15, %s1761_s16  }
  0x19   :  { %1753 = dma.done.wait [#allocation3], 512  }
  0x1a   :  { %1754 = vsyncadd [#allocation3], 4294966784 }
  0x1b   :  { %1755 = dma.done.wait [#allocation6], 256  }
  0x1c   :  { %1756 = vsyncadd [#allocation6], 4294967040  ;;  %v1639_v0 = vld [vmem:[#allocation5 + $0x8] sm:$0xff]   ;;  %v1640_v1 = vld [vmem:[#allocation5] sm:$0xff]   ;;  %vm95_vm0 = vcmask 261120   ;;  %v1763_v6 = vmov 0.0   ;;  %v573_v50 = vlaneseq }
  0x1d   :  { %1531 = vmatprep.subr.bf16.mxu0 %v1639_v0  ;;  %v1641_v2 = vld [vmem:[#allocation2] sm:$0xff]   ;;  %v1642_v3 = vld [vmem:[#allocation2 + $0x8] sm:$0xff]   ;;  %v1643_v4 = vld [vmem:[#allocation2 + $0x10] sm:$0xff]   ;;  %1543 = vmatprep.subr.bf16.mxu1 %v1763_v6  ;;  %vm1764_vm1 = vmmov 0   ;;  %s1765_s24 = smov 96   ;;  %vm592_vm3 = vcmask 64512  }
  0x1e   :  { %1532 = vmatpush3.bf16.msra.mxu0 %v1639_v0  ;;  %1535 = vmatprep.mubr.msk.bf16.mxu0 %vm95_vm0, %v1641_v2  ;;  %v1644_v5 = vld [vmem:[#allocation2 + $0x18] sm:$0xff]   ;;  %v1465_v7 = vld [vmem:[%s2003_s2] ss:$0 sm:$0xff]  ;;  %v574_v51 = vshrl.u32 %v573_v50, 7  ;;  %v576_v52 = vand.u32 127, %v573_v50  ;;  %vm1433_vm4 = vcmask 1041409  }
  0x1f   :  { %1533 = vmatprep.subr.bf16.mxu0 %v1640_v1  ;;  %1545 = vmatprep.mubr.msk.bf16.mxu1 %vm1764_vm1, %v1763_v6  ;;  %vm1435_vm5 = vcmask 1042434   ;;  %vm1437_vm6 = vcmask 1043459   ;;  %vm1439_vm7 = vcmask 1044484   ;;  %vm1441_vm8 = vcmask 1045509   ;;  %s1766_s2 = smov [#allocation7]  }
  0x20   :  { %v577_v53 = vsub.s32 %v574_v51, %v576_v52  ;;  %vm1443_vm9 = vcmask 1046534   ;;  %s1455_s25 = sshll.u32 %s1766_s2, 4  ;;  %vm1445_vm10 = vcmask 1047559   ;;  %s1456_s25 = int_to_ptr.vmem [resolvable:$true] %s1455_s25 }
  0x21   :  { %s1733_s26 = scalar_lea.vmem %s1456_s25, 128  ;;  %p1738_p11 = scmp.lt.s32.totalorder %s1456_s25, %s1456_s25 }
  0x22   :  { %1534 = vmatpush3.bf16.msra.mxu0 %v1640_v1  ;;  %v579_v54 = vsub.s32 0, %v577_v53  ;;  %p1734_p10 = scmp.ne.s32.totalorder %s1456_s25, %s1733_s26  ;;  %p1739_p12 = scmp.lt.s32.totalorder %s1733_s26, %s1733_s26 }
  0x23   :  { %1555 = vmatprep.subr.bf16.mxu0 %v1763_v6 }
  0x24   :  { %v1484_v55 = vmin.u32 %v579_v54, %v577_v53  ;;  %p1740_p13 = por %p1739_p12, %p1738_p11 }
  0x25   :  { %1536 = vmatmul.mubr.msk.bf16.vlgmr.msra.gmra.mxu0 %vm95_vm0, %v1642_v3 }
  0x26   :  { %1539 = vmatprep.mubr.msk.bf16.mxu0 %vm95_vm0, %v1643_v4  ;;  %vm581_vm2 = vcmp.le.s32.totalorder %v1484_v55, 2  ;;  %p1741_p0 = pnand %p1740_p13, %p1734_p10 }
  0x2d   :  { %1540 = vmatmul.mubr.msk.bf16.gmra.mxu0 %vm95_vm0, %v1644_v5 }
  0x2e   :  { %1557 = vmatprep.mubr.msk.bf16.mxu0 %vm1764_vm1, %v1763_v6 }
  0xe5   :  { %v1537_v8 = vpop.f32.mrf.mxu0 }
  0xe6   :  { %v151_v9 = vadd.f32 %v1537_v8, %v1465_v7 }
  0xe7   :  { %v142_v10 = vpop.f32.mrf.mxu0 }
  0xe8   :  { %v143_v11 = vadd.f32 %v1465_v7, %v142_v10  ;;  %v175_v12 = vpack.c.bf16 %v151_v9, %v151_v9 }
  0xe9   :  { %v1538_v13 = vpop.f32.mrf.mxu0 }
  0xea   :  { %v154_v14 = vadd.f32 %v1538_v13, %v1465_v7  ;;  %280 = vrot.lane.b32.xlu1 %v175_v12, %s1765_s24  ;;  %v173_v15 = vpack.c.bf16 %v143_v11, %v143_v11 }
  0xeb   :  { %v145_v16 = vpop.f32.mrf.mxu0 }
  0xec   :  { %v1810_v17 = vpack.c.bf16 %v154_v14, %v154_v14  ;;  %v146_v18 = vadd.f32 %v1465_v7, %v145_v16  ;;  %182 = vrot.lane.b32.xlu0 %v173_v15, %s1765_s24 }
  0xed   :  { %v1541_v19 = vpop.f32.mrf.mxu0 }
  0xee   :  { %v174_v20 = vpack.c.bf16 %v146_v18, %v146_v18  ;;  %329 = vrot.lane.b32.xlu1 %v1810_v17, %s1765_s24  ;;  %v1813_v22 = vadd.f32 %v1541_v19, %v1465_v7 }
  0xef   :  { %v158_v21 = vpop.f32.mrf.mxu0 }
  0xf0   :  { %v159_v23 = vadd.f32 %v1465_v7, %v158_v21  ;;  %231 = vrot.lane.b32.xlu0 %v174_v20, %s1765_s24  ;;  %v179_v27 = vpack.c.bf16 %v1813_v22, %v1813_v22 }
  0xf1   :  { %v1542_v24 = vpop.f32.mrf.mxu0 }
  0xf2   :  { %v177_v25 = vpack.c.bf16 %v159_v23, %v159_v23  ;;  %v1817_v28 = vadd.f32 %v1542_v24, %v1465_v7 }
  0xf3   :  { %v161_v26 = vpop.f32.mrf.mxu0 }
  0xf4   :  { %v162_v29 = vadd.f32 %v1465_v7, %v161_v26  ;;  %378 = vrot.lane.b32.xlu0 %v177_v25, %s1765_s24  ;;  %v180_v31 = vpack.c.bf16 %v1817_v28, %v1817_v28 }
  0xf6   :  { %v178_v30 = vpack.c.bf16 %v162_v29, %v162_v29 }
  0xf8   :  { %427 = vrot.lane.b32.xlu1 %v178_v30, %s1765_s24  ;;  %476 = vrot.lane.b32.xlu0 %v179_v27, %s1765_s24 }
  0xfc   :  { %525 = vrot.lane.b32.xlu1 %v180_v31, %s1765_s24  ;;  %791 = vrot.lane.b32.xlu0 %v146_v18, %s1760_s15 }
 0x100   :  { %714 = vrot.lane.b32.xlu1 %v143_v11, %s1760_s15  ;;  %1022 = vrot.lane.b32.xlu0 %v159_v23, %s1760_s15 }
 0x104   :  { %868 = vrot.lane.b32.xlu1 %v151_v9, %s1760_s15 }
 0x108   :  { %945 = vrot.lane.b32.xlu1 %v154_v14, %s1760_s15 }
 0x10c   :  { %1099 = vrot.lane.b32.xlu1 %v162_v29, %s1760_s15 }
 0x15c   :  { %v281_v32 = vpop.permute.xlu1 %280 }
 0x15d   :  { %v286_v33 = vsel %vm95_vm0, %v281_v32, 0 }
 0x15e   :  { %1556 = vmatpush3.bf16.xpose.msra.mxu0 %v286_v33  ;;  %v183_v34 = vpop.permute.xlu0 %182 }
 0x15f   :  { %v188_v35 = vsel %vm95_vm0, %v183_v34, 0  ;;  %1567 = vmatprep.subr.bf16.mxu0 %v1763_v6 }
 0x160   :  { %1544 = vmatpush3.bf16.xpose.msra.mxu1 %v188_v35  ;;  %v330_v38 = vpop.permute.xlu1 %329 }
 0x161   :  { %1549 = vmatprep.subr.bf16.mxu1 %v1763_v6  ;;  %v335_v44 = vsel %vm95_vm0, %v330_v38, 0 }
 0x162   :  { %v232_v36 = vpop.permute.xlu0 %231 }
 0x163   :  { %v237_v39 = vsel %vm95_vm0, %v232_v36, 0 }
 0x165   :  { %1558 = vmatmul.mubr.msk.bf16.vlgmr.msra.gmra.mxu0 %vm95_vm0, %v175_v12 }
 0x166   :  { %v379_v37 = vpop.permute.xlu0 %378  ;;  %1569 = vmatprep.mubr.msk.bf16.mxu0 %vm1764_vm1, %v1763_v6 }
 0x167   :  { %v384_v40 = vsel %vm95_vm0, %v379_v37, 0  ;;  %1546 = vmatmul.mubr.msk.bf16.vlgmr.msra.gmra.mxu1 %vm95_vm0, %v173_v15 }
 0x168   :  { %1550 = vmatpush3.bf16.xpose.msra.mxu1 %v237_v39  ;;  %1568 = vmatpush3.bf16.xpose.msra.mxu0 %v384_v40 }
 0x169   :  { %1551 = vmatprep.mubr.msk.bf16.mxu1 %vm1764_vm1, %v1763_v6  ;;  %1561 = vmatprep.subr.bf16.mxu1 %v1763_v6 }
 0x16a   :  { %1579 = vmatprep.subr.bf16.mxu0 %v1763_v6  ;;  %v428_v41 = vpop.permute.xlu1 %427  ;;  %v477_v42 = vpop.permute.xlu0 %476 }
 0x16b   :  { %v482_v43 = vsel %vm95_vm0, %v477_v42, 0  ;;  %v433_v46 = vsel %vm95_vm0, %v428_v41, 0 }
 0x16e   :  { %v526_v45 = vpop.permute.xlu1 %525  ;;  %v792_v49 = vpop.permute.xlu0 %791 }
 0x16f   :  { %1552 = vmatmul.mubr.msk.bf16.vlgmr.msra.gmra.mxu1 %vm95_vm0, %v174_v20  ;;  %1570 = vmatmul.mubr.msk.bf16.vlgmr.msra.gmra.mxu0 %vm95_vm0, %v177_v25  ;;  %v531_v48 = vsel %vm95_vm0, %v526_v45, 0 }
 0x170   :  { %1562 = vmatpush3.bf16.xpose.msra.mxu1 %v335_v44  ;;  %1580 = vmatpush3.bf16.xpose.msra.mxu0 %v482_v43 }
 0x171   :  { %1563 = vmatprep.mubr.msk.bf16.mxu1 %vm1764_vm1, %v1763_v6  ;;  %1581 = vmatprep.mubr.msk.bf16.mxu0 %vm1764_vm1, %v1763_v6 }
 0x172   :  { %1573 = vmatprep.subr.bf16.mxu1 %v1763_v6  ;;  %1591 = vmatprep.subr.mxu0 %v1763_v6  ;;  %v715_v47 = vpop.permute.xlu1 %714  ;;  %v1023_v44 = vpop.permute.xlu0 %1022 }
 0x176   :  { %v869_v43 = vpop.permute.xlu1 %868 }
 0x177   :  { %1564 = vmatmul.mubr.msk.bf16.vlgmr.msra.gmra.mxu1 %vm95_vm0, %v1810_v17  ;;  %1582 = vmatmul.mubr.msk.bf16.vlgmr.msra.gmra.mxu0 %vm95_vm0, %v179_v27 }
 0x178   :  { %1574 = vmatpush3.bf16.xpose.msra.mxu1 %v433_v46  ;;  %1592 = vmatpush3.msra.mxu0 %v715_v47 }
 0x179   :  { %1575 = vmatprep.mubr.msk.bf16.mxu1 %vm1764_vm1, %v1763_v6  ;;  %1585 = vmatprep.subr.bf16.mxu1 %v1763_v6 }
 0x17a   :  { %1593 = vmatprep.mubr.msk.f32.mxu0 %vm1764_vm1, %v1763_v6  ;;  %1601 = vmatprep.subr.mxu0 %v1763_v6  ;;  %v946_v45 = vpop.permute.xlu1 %945 }
 0x17f   :  { %1576 = vmatmul.mubr.msk.bf16.vlgmr.msra.gmra.mxu1 %vm95_vm0, %v178_v30 }
 0x180   :  { %1586 = vmatpush3.bf16.xpose.msra.mxu1 %v531_v48  ;;  %1587 = vmatprep.mubr.msk.bf16.mxu1 %vm1764_vm1, %v1763_v6 }
 0x181   :  { %1596 = vmatprep.subr.mxu1 %v1763_v6 }
 0x187   :  { %1588 = vmatmul.mubr.msk.bf16.vlgmr.msra.gmra.mxu1 %vm95_vm0, %v180_v31 }
 0x188   :  { %1597 = vmatpush3.msra.mxu1 %v792_v49  ;;  %1598 = vmatprep.mubr.msk.f32.mxu1 %vm1764_vm1, %v1763_v6 }
 0x189   :  { %1606 = vmatprep.subr.mxu1 %v1763_v6 }
 0x225   :  { %v322_v56 = vpop.f32.mrf.mxu0 }
 0x226   :  { %v586_v57 = vsel %vm581_vm2, %v322_v56, -1e+30 }
 0x227   :  { %v224_v58 = vpop.f32.mrf.mxu1  ;;  %v1559_v59 = vpop.f32.mrf.mxu0  ;;  %v599_v60 = vsel %vm592_vm3, %v586_v57, -inf }
 0x228   :  { %v1873_v61 = vsel %vm581_vm2, %v224_v58, -1e+30  ;;  %600 = vmax.xlane.f32.xlu0 %v599_v60 }
 0x229   :  { %v1547_v62 = vpop.f32.mrf.mxu1  ;;  %v325_v63 = vpop.f32.mrf.mxu0  ;;  %v593_v2 = vsel %vm592_vm3, %v1873_v61, -inf }
 0x22b   :  { %v227_v0 = vpop.f32.mrf.mxu1  ;;  %v1560_v1 = vpop.f32.mrf.mxu0 }
 0x22c   :  { %594 = vmax.xlane.f32.xlu0 %v593_v2 }
 0x22d   :  { %v1548_v3 = vpop.f32.mrf.mxu1 }
 0x22f   :  { %v273_v4 = vpop.f32.mrf.mxu1  ;;  %v420_v5 = vpop.f32.mrf.mxu0 }
 0x230   :  { %v585_v7 = vsel %vm581_vm2, %v273_v4, -1e+30  ;;  %v588_v11 = vsel %vm581_vm2, %v420_v5, -1e+30 }
 0x231   :  { %v1553_v8 = vpop.f32.mrf.mxu1  ;;  %v1571_v9 = vpop.f32.mrf.mxu0  ;;  %v596_v10 = vsel %vm592_vm3, %v585_v7, -inf  ;;  %v605_v16 = vsel %vm592_vm3, %v588_v11, -inf }
 0x232   :  { %597 = vmax.xlane.f32.xlu1 %v596_v10 }
 0x233   :  { %v276_v12 = vpop.f32.mrf.mxu1  ;;  %v423_v13 = vpop.f32.mrf.mxu0 }
 0x235   :  { %v1554_v14 = vpop.f32.mrf.mxu1  ;;  %v1572_v15 = vpop.f32.mrf.mxu0 }
 0x236   :  { %606 = vmax.xlane.f32.xlu1 %v605_v16 }
 0x237   :  { %v371_v17 = vpop.f32.mrf.mxu1  ;;  %v518_v18 = vpop.f32.mrf.mxu0 }
 0x238   :  { %v587_v19 = vsel %vm581_vm2, %v371_v17, -1e+30  ;;  %v590_v20 = vsel %vm581_vm2, %v518_v18, -1e+30 }
 0x239   :  { %v1565_v21 = vpop.f32.mrf.mxu1  ;;  %v1583_v23 = vpop.f32.mrf.mxu0  ;;  %v602_v24 = vsel %vm592_vm3, %v587_v19, -inf  ;;  %v611_v25 = vsel %vm592_vm3, %v590_v20, -inf }
 0x23a   :  { %603 = vmax.xlane.f32.xlu0 %v602_v24  ;;  %612 = vmax.xlane.f32.xlu1 %v611_v25 }
 0x23b   :  { %v374_v26 = vpop.f32.mrf.mxu1  ;;  %v521_v27 = vpop.f32.mrf.mxu0 }
 0x23d   :  { %v1566_v29 = vpop.f32.mrf.mxu1  ;;  %v1584_v30 = vpop.f32.mrf.mxu0 }
 0x23f   :  { %v469_v31 = vpop.f32.mrf.mxu1 }
 0x240   :  { %v589_v32 = vsel %vm581_vm2, %v469_v31, -1e+30 }
 0x241   :  { %v1577_v33 = vpop.f32.mrf.mxu1  ;;  %v608_v34 = vsel %vm592_vm3, %v589_v32, -inf }
 0x242   :  { %609 = vmax.xlane.f32.xlu0 %v608_v34 }
 0x243   :  { %v472_v35 = vpop.f32.mrf.mxu1 }
 0x245   :  { %v1578_v36 = vpop.f32.mrf.mxu1 }
 0x247   :  { %v567_v37 = vpop.f32.mrf.mxu1 }
 0x248   :  { %v1888_v38 = vsel %vm581_vm2, %v567_v37, -1e+30 }
 0x249   :  { %v1589_v39 = vpop.f32.mrf.mxu1  ;;  %v614_v40 = vsel %vm592_vm3, %v1888_v38, -inf }
 0x24a   :  { %615 = vmax.xlane.f32.xlu0 %v614_v40 }
 0x24b   :  { %v570_v41 = vpop.f32.mrf.mxu1  ;;  %1253 = vrot.lane.b32.xlu1 %v1817_v28, %s1760_s15  ;;  %v1904_v28 = vpop.permute.xlu1 %1099 }
 0x24d   :  { %v1590_v42 = vpop.f32.mrf.mxu1 }
 0x260   :  { %1176 = vrot.lane.b32.xlu0 %v1813_v22, %s1760_s15 }
 0x2b1   :  { %v1896_v46 = vpop.xlane.xlu0 %600 }
 0x2b2   :  { %v619_v47 = vmax.f32 %v1896_v46, -1e+30 }
 0x2b4   :  { %v651_v48 = vsub.f32 %v586_v57, %v619_v47  ;;  %v627_v35 = vsub.f32 -1e+30, %v619_v47 }
 0x2b5   :  { %v1901_v49 = vpop.xlane.xlu0 %594 }
 0x2b6   :  { %v661_v50 = vmul.f32 1.442695, %v651_v48  ;;  %v617_v51 = vmax.f32 %v1901_v49, -1e+30 }
 0x2b8   :  { %v649_v22 = vsub.f32 %v1873_v61, %v617_v51  ;;  %1645 = vpow2.f32 %v661_v50  ;;  %v625_v34 = vsub.f32 -1e+30, %v617_v51 }
 0x2ba   :  { %v657_v52 = vmul.f32 1.442695, %v649_v22  ;;  %v633_v36 = vmul.f32 1.442695, %v625_v34 }
 0x2bb   :  { %v1909_v53 = vpop.xlane.xlu1 %597 }
 0x2bc   :  { %v618_v54 = vmax.f32 %v1909_v53, -1e+30  ;;  %1647 = vpow2.f32 %v657_v52 }
 0x2be   :  { %v650_v55 = vsub.f32 %v585_v7, %v618_v54  ;;  %v626_v37 = vsub.f32 -1e+30, %v618_v54 }
 0x2bf   :  { %v1914_v56 = vpop.xlane.xlu1 %606 }
 0x2c0   :  { %v659_v57 = vmul.f32 1.442695, %v650_v55  ;;  %v621_v58 = vmax.f32 %v1914_v56, -1e+30  ;;  %v635_v39 = vmul.f32 1.442695, %v626_v37 }
 0x2c2   :  { %v653_v59 = vsub.f32 %v588_v11, %v621_v58  ;;  %1649 = vpow2.f32 %v659_v57 }
 0x2c3   :  { %v1919_v60 = vpop.xlane.xlu1 %612  ;;  %v1921_v61 = vpop.xlane.xlu0 %603 }
 0x2c4   :  { %v665_v62 = vmul.f32 1.442695, %v653_v59  ;;  %v623_v63 = vmax.f32 %v1919_v60, -1e+30  ;;  %v620_v0 = vmax.f32 %v1921_v61, -1e+30 }
 0x2c5   :  { %v1646_v1 = vpop.eup %1645 }
 0x2c6   :  { %v655_v2 = vsub.f32 %v590_v20, %v623_v63  ;;  %1651 = vpow2.f32 %v665_v62  ;;  %v652_v3 = vsub.f32 %v587_v19, %v620_v0  ;;  %v687_v4 = vsel %vm592_vm3, %v1646_v1, 0.0 }
 0x2c7   :  { %688 = vadd.xlane.f32.xlu0 %v687_v4  ;;  %v1254_v30 = vpop.permute.xlu1 %1253  ;;  %v631_v41 = vsub.f32 -1e+30, %v623_v63  ;;  %v628_v42 = vsub.f32 -1e+30, %v620_v0 }
 0x2c8   :  { %v669_v5 = vmul.f32 1.442695, %v655_v2  ;;  %v663_v7 = vmul.f32 1.442695, %v652_v3 }
 0x2c9   :  { %v1648_v8 = vpop.eup %1647 }
 0x2ca   :  { %1653 = vpow2.f32 %v669_v5  ;;  %1594 = vmatmul.mubr.msk.f32.vlgmr.msra.gmra.mxu0 %vm592_vm3, %v1648_v8  ;;  %v681_v9 = vsel %vm592_vm3, %v1648_v8, 0.0 }
 0x2cb   :  { %v1932_v10 = vpop.xlane.xlu0 %609  ;;  %1602 = vmatpush3.msra.mxu0 %v869_v43  ;;  %682 = vadd.xlane.f32.xlu0 %v681_v9  ;;  %1655 = vpow2.f32 %v663_v7 }
 0x2cc   :  { %v622_v11 = vmax.f32 %v1932_v10, -1e+30  ;;  %1603 = vmatprep.mubr.msk.f32.mxu0 %vm1764_vm1, %v1763_v6  ;;  %1611 = vmatprep.subr.mxu0 %v1763_v6 }
 0x2ce   :  { %v654_v12 = vsub.f32 %v589_v32, %v622_v11  ;;  %1604 = vmatmul.mubr.msk.f32.vlgmr.msra.gmra.mxu0 %vm592_vm3, %v1646_v1  ;;  %v630_v47 = vsub.f32 -1e+30, %v622_v11 }
 0x2cf   :  { %v1650_v13 = vpop.eup %1649  ;;  %1612 = vmatpush3.msra.mxu0 %v1023_v44  ;;  %1613 = vmatprep.mubr.msk.f32.mxu0 %vm1764_vm1, %v1763_v6  ;;  %v645_v44 = vmul.f32 1.442695, %v631_v41 }
 0x2d0   :  { %v667_v14 = vmul.f32 1.442695, %v654_v12  ;;  %1599 = vmatmul.mubr.msk.f32.vlgmr.msra.gmra.mxu1 %vm592_vm3, %v1650_v13  ;;  %v684_v15 = vsel %vm592_vm3, %v1650_v13, 0.0  ;;  %1621 = vmatprep.subr.mxu0 %v1763_v6  ;;  %v643_v51 = vmul.f32 1.442695, %v630_v47 }
 0x2d1   :  { %1607 = vmatpush3.msra.mxu1 %v946_v45  ;;  %685 = vadd.xlane.f32.xlu1 %v684_v15  ;;  %v639_v45 = vmul.f32 1.442695, %v628_v42 }
 0x2d2   :  { %1657 = vpow2.f32 %v667_v14  ;;  %1608 = vmatprep.mubr.msk.f32.mxu1 %vm1764_vm1, %v1763_v6  ;;  %1616 = vmatprep.subr.mxu1 %v1763_v6 }
 0x2d3   :  { %v1946_v16 = vpop.xlane.xlu0 %615  ;;  %v1652_v17 = vpop.eup %1651 }
 0x2d4   :  { %v624_v18 = vmax.f32 %v1946_v16, -1e+30  ;;  %1614 = vmatmul.mubr.msk.f32.vlgmr.msra.gmra.mxu0 %vm592_vm3, %v1652_v17  ;;  %v693_v19 = vsel %vm592_vm3, %v1652_v17, 0.0 }
 0x2d5   :  { %694 = vadd.xlane.f32.xlu1 %v693_v19  ;;  %1623 = vmatprep.mubr.msk.f32.mxu0 %vm1764_vm1, %v1763_v6 }
 0x2d6   :  { %v656_v20 = vsub.f32 %v1888_v38, %v624_v18  ;;  %v637_v38 = vmul.f32 1.442695, %v627_v35  ;;  %v632_v54 = vsub.f32 -1e+30, %v624_v18 }
 0x2d7   :  { %v1177_v21 = vpop.permute.xlu0 %1176  ;;  %v1654_v23 = vpop.eup %1653 }
 0x2d8   :  { %v671_v24 = vmul.f32 1.442695, %v656_v20  ;;  %1622 = vmatpush3.msra.mxu0 %v1177_v21  ;;  %v699_v25 = vsel %vm592_vm3, %v1654_v23, 0.0  ;;  %v1656_v26 = vpop.eup %1655  ;;  %v647_v60 = vmul.f32 1.442695, %v632_v54 }
 0x2d9   :  { %1624 = vmatmul.mubr.msk.f32.vlgmr.msra.gmra.mxu0 %vm592_vm3, %v1654_v23  ;;  %700 = vadd.xlane.f32.xlu1 %v699_v25  ;;  %v690_v27 = vsel %vm592_vm3, %v1656_v26, 0.0 }
 0x2da   :  { %1659 = vpow2.f32 %v671_v24  ;;  %1609 = vmatmul.mubr.msk.f32.vlgmr.msra.gmra.mxu1 %vm592_vm3, %v1656_v26  ;;  %691 = vadd.xlane.f32.xlu0 %v690_v27 }
 0x2db   :  { %1617 = vmatpush3.msra.mxu1 %v1904_v28  ;;  %1618 = vmatprep.mubr.msk.f32.mxu1 %vm1764_vm1, %v1763_v6  ;;  %1661 = vpow2.f32 %v633_v36 }
 0x2dc   :  { %1626 = vmatprep.subr.mxu1 %v1763_v6  ;;  %1663 = vpow2.f32 %v637_v38 }
 0x2dd   :  { %1665 = vpow2.f32 %v635_v39 }
 0x2df   :  { %v1658_v29 = vpop.eup %1657 }
 0x2e0   :  { %1619 = vmatmul.mubr.msk.f32.vlgmr.msra.gmra.mxu1 %vm592_vm3, %v1658_v29  ;;  %v696_v31 = vsel %vm592_vm3, %v1658_v29, 0.0 }
 0x2e1   :  { %1627 = vmatpush3.msra.mxu1 %v1254_v30  ;;  %697 = vadd.xlane.f32.xlu0 %v696_v31 }
 0x2e2   :  { %1628 = vmatprep.mubr.msk.f32.mxu1 %vm1764_vm1, %v1763_v6  ;;  %v629_v6 = vsub.f32 -1e+30, %v621_v58 }
 0x2e4   :  { %v641_v40 = vmul.f32 1.442695, %v629_v6 }
 0x2e6   :  { %1667 = vpow2.f32 %v641_v40 }
 0x2e7   :  { %v1660_v32 = vpop.eup %1659  ;;  %1669 = vpow2.f32 %v645_v44 }
 0x2e8   :  { %1629 = vmatmul.mubr.msk.f32.vlgmr.msra.gmra.mxu1 %vm592_vm3, %v1660_v32  ;;  %v702_v33 = vsel %vm592_vm3, %v1660_v32, 0.0  ;;  %v1662_v46 = vpop.eup %1661  ;;  %1671 = vpow2.f32 %v639_v45 }
 0x2e9   :  { %703 = vadd.xlane.f32.xlu0 %v702_v33  ;;  %v673_v49 = vmul.f32 0.0, %v1662_v46  ;;  %v1664_v50 = vpop.eup %1663  ;;  %1673 = vpow2.f32 %v643_v51 }
 0x2ea   :  { %v1666_v52 = vpop.eup %1665  ;;  %v675_v53 = vmul.f32 0.0, %v1664_v50 }
 0x2eb   :  { %v674_v56 = vmul.f32 0.0, %v1666_v52 }
 0x2f3   :  { %v1668_v57 = vpop.eup %1667 }
 0x2f4   :  { %v677_v61 = vmul.f32 0.0, %v1668_v57  ;;  %v1670_v62 = vpop.eup %1669 }
 0x2f5   :  { %v1672_v0 = vpop.eup %1671  ;;  %v679_v2 = vmul.f32 0.0, %v1670_v62 }
 0x2f6   :  { %v676_v5 = vmul.f32 0.0, %v1672_v0  ;;  %v1674_v8 = vpop.eup %1673 }
 0x2f7   :  { %v1985_v16 = vmul.f32 0.0, %v1674_v8 }
 0x350   :  { %v689_v43 = vpop.xlane.xlu0 %688 }
 0x351   :  { %v707_v55 = vadd.f32 %v689_v43, %v675_v53 }
 0x354   :  { %v683_v48 = vpop.xlane.xlu0 %682 }
 0x355   :  { %v705_v22 = vadd.f32 %v683_v48, %v673_v49 }
 0x357   :  { %1675 = vrcp.f32 %v705_v22 }
 0x358   :  { %1677 = vrcp.f32 %v707_v55 }
 0x35a   :  { %v686_v28 = vpop.xlane.xlu1 %685 }
 0x35b   :  { %v706_v59 = vadd.f32 %v686_v28, %v674_v56 }
 0x35d   :  { %1679 = vrcp.f32 %v706_v59 }
 0x35e   :  { %v695_v58 = vpop.xlane.xlu1 %694  ;;  %1681 = vpow2.f32 %v647_v60 }
 0x35f   :  { %v709_v63 = vadd.f32 %v695_v58, %v677_v61 }
 0x361   :  { %1683 = vrcp.f32 %v709_v63 }
 0x362   :  { %v701_v1 = vpop.xlane.xlu1 %700 }
 0x363   :  { %v692_v3 = vpop.xlane.xlu0 %691  ;;  %v711_v4 = vadd.f32 %v701_v1, %v679_v2 }
 0x364   :  { %v708_v9 = vadd.f32 %v692_v3, %v676_v5  ;;  %v1676_v11 = vpop.eup %1675 }
 0x365   :  { %1685 = vrcp.f32 %v711_v4  ;;  %v1678_v19 = vpop.eup %1677 }
 0x366   :  { %1687 = vrcp.f32 %v708_v9 }
 0x36a   :  { %v698_v14 = vpop.xlane.xlu0 %697  ;;  %v1680_v27 = vpop.eup %1679 }
 0x36b   :  { %v710_v24 = vadd.f32 %v698_v14, %v1985_v16  ;;  %v1682_v33 = vpop.eup %1681 }
 0x36c   :  { %v680_v44 = vmul.f32 0.0, %v1682_v33 }
 0x36d   :  { %1689 = vrcp.f32 %v710_v24 }
 0x36e   :  { %v1684_v39 = vpop.eup %1683 }
 0x372   :  { %v704_v6 = vpop.xlane.xlu0 %703  ;;  %v1686_v28 = vpop.eup %1685 }
 0x373   :  { %v1688_v59 = vpop.eup %1687 }
 0x38a   :  { %v786_v7 = vpop.f32.mrf.mxu0 }
 0x38b   :  { %v1329_v10 = vadd.f32 %v786_v7, %v673_v49  ;;  %v712_v49 = vadd.f32 %v704_v6, %v680_v44 }
 0x38c   :  { %v1595_v12 = vpop.f32.mrf.mxu0 }
 0x38d   :  { %v1345_v13 = vmul.f32 %v1676_v11, %v1329_v10  ;;  %1691 = vrcp.f32 %v712_v49 }
 0x38e   :  { %v940_v15 = vpop.f32.mrf.mxu0 }
 0x38f   :  { %v1353_v17 = vsel %vm95_vm0, %v1345_v13, 0.0  ;;  %v1331_v18 = vadd.f32 %v940_v15, %v675_v53  ;;  %v1690_v15 = vpop.eup %1689 }
 0x390   :  { %v1354_v20 = vrot.slane %v1353_v17, 4  ;;  %v863_v21 = vpop.f32.mrf.mxu1  ;;  %v1605_v23 = vpop.f32.mrf.mxu0 }
 0x391   :  { %v1347_v25 = vmul.f32 %v1678_v19, %v1331_v18  ;;  %v1330_v26 = vadd.f32 %v863_v21, %v674_v56 }
 0x392   :  { %v1355_v29 = vadd.f32 %v1354_v20, %v1353_v17  ;;  %v1600_v30 = vpop.f32.mrf.mxu1 }
 0x393   :  { %v1367_v31 = vsel %vm95_vm0, %v1347_v25, 0.0  ;;  %v1346_v32 = vmul.f32 %v1680_v27, %v1330_v26 }
 0x394   :  { %v1356_v34 = vrot.slane %v1355_v29, 2  ;;  %v1368_v35 = vrot.slane %v1367_v31, 4  ;;  %v1094_v36 = vpop.f32.mrf.mxu0 }
 0x395   :  { %v1360_v37 = vsel %vm95_vm0, %v1346_v32, 0.0  ;;  %v1333_v38 = vadd.f32 %v1094_v36, %v677_v61 }
 0x396   :  { %v1357_v40 = vadd.f32 %v1356_v34, %v1355_v29  ;;  %v1369_v41 = vadd.f32 %v1368_v35, %v1367_v31  ;;  %v1361_v42 = vrot.slane %v1360_v37, 4  ;;  %v1615_v43 = vpop.f32.mrf.mxu0 }
 0x397   :  { %v1349_v45 = vmul.f32 %v1684_v39, %v1333_v38 }
 0x398   :  { %v1370_v46 = vrot.slane %v1369_v41, 2  ;;  %v1362_v47 = vadd.f32 %v1361_v42, %v1360_v37  ;;  %v1358_v22 = vrot.slane %v1357_v40, 1 }
 0x399   :  { %v1248_v48 = vpop.f32.mrf.mxu0  ;;  %v1381_v50 = vsel %vm95_vm0, %v1349_v45, 0.0 }
 0x39a   :  { %v1335_v51 = vadd.f32 %v1248_v48, %v679_v2  ;;  %v1371_v52 = vadd.f32 %v1370_v46, %v1369_v41  ;;  %v1363_v53 = vrot.slane %v1362_v47, 2  ;;  %v1382_v54 = vrot.slane %v1381_v50, 4  ;;  %v1017_v55 = vpop.f32.mrf.mxu1  ;;  %v1692_v38 = vpop.eup %1691 }
 0x39b   :  { %v1625_v56 = vpop.f32.mrf.mxu0  ;;  %v1332_v57 = vadd.f32 %v1017_v55, %v676_v5  ;;  %v1359_v3 = vadd.f32 %v1358_v22, %v1357_v40 }
 0x39c   :  { %v1351_v58 = vmul.f32 %v1686_v28, %v1335_v51  ;;  %v1372_v60 = vrot.slane %v1371_v52, 1  ;;  %v1364_v61 = vadd.f32 %v1363_v53, %v1362_v47  ;;  %v1383_v62 = vadd.f32 %v1382_v54, %v1381_v50  ;;  %v1610_v63 = vpop.f32.mrf.mxu1 }
 0x39d   :  { %v1348_v0 = vmul.f32 %v1688_v59, %v1332_v57  ;;  %v1417_v17 = vmul.f32 0.125, %v1359_v3 }
 0x39e   :  { %v1395_v1 = vsel %vm95_vm0, %v1351_v58, 0.0  ;;  %v1365_v2 = vrot.slane %v1364_v61, 1  ;;  %v1384_v4 = vrot.slane %v1383_v62, 2  ;;  %v1373_v8 = vadd.f32 %v1372_v60, %v1371_v52 }
 0x39f   :  { %v1396_v7 = vrot.slane %v1395_v1, 4  ;;  %v1374_v9 = vsel %vm95_vm0, %v1348_v0, 0.0 }
 0x3a0   :  { %v1366_v10 = vadd.f32 %v1365_v2, %v1364_v61  ;;  %v1375_v11 = vrot.slane %v1374_v9, 4  ;;  %v1171_v5 = vpop.f32.mrf.mxu1  ;;  %v1385_v12 = vadd.f32 %v1384_v4, %v1383_v62  ;;  %v1419_v21 = vmul.f32 0.125, %v1373_v8 }
 0x3a1   :  { %v1397_v13 = vadd.f32 %v1396_v7, %v1395_v1  ;;  %v1334_v14 = vadd.f32 %v1171_v5, %v1985_v16 }
 0x3a2   :  { %v1418_v18 = vmul.f32 0.125, %v1366_v10  ;;  %v1376_v19 = vadd.f32 %v1375_v11, %v1374_v9  ;;  %v1620_v20 = vpop.f32.mrf.mxu1  ;;  %v1386_v27 = vrot.slane %v1385_v12, 1 }
 0x3a3   :  { %v1398_v23 = vrot.slane %v1397_v13, 2  ;;  %v1350_v24 = vmul.f32 %v1690_v15, %v1334_v14 }
 0x3a4   :  { %v1434_v25 = vsel %vm1433_vm4, %v1418_v18, %v1417_v17  ;;  %v1377_v26 = vrot.slane %v1376_v19, 2  ;;  %v1387_v36 = vadd.f32 %v1386_v27, %v1385_v12 }
 0x3a5   :  { %v1388_v29 = vsel %vm95_vm0, %v1350_v24, 0.0  ;;  %v1436_v30 = vsel %vm1435_vm5, %v1419_v21, %v1434_v25  ;;  %v1399_v33 = vadd.f32 %v1398_v23, %v1397_v13 }
 0x3a6   :  { %v1378_v31 = vadd.f32 %v1377_v26, %v1376_v19  ;;  %v1389_v32 = vrot.slane %v1388_v29, 4  ;;  %v1421_v46 = vmul.f32 0.125, %v1387_v36 }
 0x3a7   :  { %v1400_v41 = vrot.slane %v1399_v33, 1 }
 0x3a8   :  { %v1379_v34 = vrot.slane %v1378_v31, 1  ;;  %v1390_v16 = vadd.f32 %v1389_v32, %v1388_v29  ;;  %v1325_v35 = vpop.f32.mrf.mxu1 }
 0x3a9   :  { %v1336_v37 = vadd.f32 %v1325_v35, %v680_v44  ;;  %v1401_v51 = vadd.f32 %v1400_v41, %v1399_v33 }
 0x3aa   :  { %v1380_v39 = vadd.f32 %v1379_v34, %v1378_v31  ;;  %v1391_v6 = vrot.slane %v1390_v16, 2  ;;  %v1630_v40 = vpop.f32.mrf.mxu1 }
 0x3ab   :  { %v1352_v42 = vmul.f32 %v1692_v38, %v1336_v37  ;;  %v1423_v54 = vmul.f32 0.125, %v1401_v51 }
 0x3ac   :  { %v1420_v43 = vmul.f32 0.125, %v1380_v39  ;;  %v1392_v45 = vadd.f32 %v1391_v6, %v1390_v16 }
 0x3ad   :  { %v1402_v47 = vsel %vm95_vm0, %v1352_v42, 0.0 }
 0x3ae   :  { %v1393_v48 = vrot.slane %v1392_v45, 1  ;;  %v1403_v49 = vrot.slane %v1402_v47, 4  ;;  %v1438_v50 = vsel %vm1437_vm6, %v1420_v43, %v1436_v30 }
 0x3af   :  { %v1440_v28 = vsel %vm1439_vm7, %v1421_v46, %v1438_v50 }
 0x3b0   :  { %v1394_v22 = vadd.f32 %v1393_v48, %v1392_v45  ;;  %v1404_v44 = vadd.f32 %v1403_v49, %v1402_v47 }
 0x3b2   :  { %v1422_v52 = vmul.f32 0.125, %v1394_v22  ;;  %v1405_v53 = vrot.slane %v1404_v44, 2 }
 0x3b4   :  { %v1406_v55 = vadd.f32 %v1405_v53, %v1404_v44  ;;  %v1442_v56 = vsel %vm1441_vm8, %v1422_v52, %v1440_v28 }
 0x3b5   :  { %v1444_v57 = vsel %vm1443_vm9, %v1423_v54, %v1442_v56 }
 0x3b6   :  { %v1407_v58 = vrot.slane %v1406_v55, 1 }
 0x3b8   :  { %v1408_v59 = vadd.f32 %v1407_v58, %v1406_v55 }
 0x3ba   :  { %v1424_v60 = vmul.f32 0.125, %v1408_v59 }
 0x3bc   :  { %v1446_v61 = vsel %vm1445_vm10, %v1424_v60, %v1444_v57 }
 0x3bd   :  { %1448 = vst.msk [vmem:[#allocation7] sm:$0xff] %vm95_vm0, %v1446_v61 }
 0x3be   :  { %1744 = shalt.err (!%p1741_p0)
}
 0x3bf   :  { %1458 = dma.vmem_to_hbm [thread:$0]  %s1456_s25, 128, %s2004_s3, [#allocation4]  }
 0x3c0   :  { %1757 = dma.done.wait [#allocation4], 128  }
 0x3c1   :  { %1758 = vsyncadd [#allocation4], 4294967168 }
 0x3c2   :  { %1462 = vsyncpa [#allocation3], 1 }
 0x3c3   :  { %1463 = vsyncpa [#allocation6], 1 }
 0x3c4   :  { %1464 = vsyncpa [#allocation4], 1 }

</bundles_post_ra>
